<compile_context>
chip_gen: v5e
topology: v5e:2x2
jax: 0.10.0
libtpu: 0.0.40
codegen_flags: <defaults>
</compile_context>

<pallas_src>
import jax
import jax.numpy as jnp
from jax.experimental import pallas as pl
from jax.experimental.pallas import tpu as pltpu

LANE = 128
SUBLANE = 8
_DEFAULT_VMEM_BUDGET = 16 * 1024 * 1024   # safe under every generation's default scoped VMEM
_MAX_VMEM_REQUEST = 32 * 1024 * 1024


def _round_up(x, m):
    return (x + m - 1) // m * m


def _pad2d(x, rows, cols):
    r, c = x.shape
    if r == rows and c == cols:
        return x
    return jnp.pad(x, ((0, rows - r), (0, cols - c)))


def _vmem_budget_bytes():
    """Generation-aware VMEM budget (fallback: 16 MiB, fits v5e's default scoped VMEM)."""
    budget = _DEFAULT_VMEM_BUDGET
    try:
        info = pltpu.get_tpu_info()
        cap = int(getattr(info, "vmem_capacity_bytes", 0) or 0)
        if cap > 0:
            budget = min(max(budget, cap // 4), _MAX_VMEM_REQUEST)
    except Exception:
        pass
    return budget


def _num_tensorcores():
    """Best-effort count of TensorCores behind one JAX device (dual-TC / megacore chips)."""
    try:
        info = pltpu.get_tpu_info()
        for name in ("num_cores", "core_count", "tensorcore_count"):
            v = getattr(info, name, None)
            if isinstance(v, int) and v > 0:
                return v
    except Exception:
        pass
    try:
        kind = jax.devices()[0].device_kind.lower()
    except Exception:
        return 1
    if any(tag in kind for tag in ("v4", "v5p", "7")):
        return 2   # dual-TC / megacore: give the grid 2 parallel steps
    return 1


def actor_kernel(x_ref, w1_ref, b1_ref, w2_ref, b2_ref, w3_ref, b3_ref,
                 scale_ref, shift_ref, out_ref):
    x = x_ref[...]                                                    # (tb, in_dim)

    # linear1 + ReLU   (hidden padded to 128 lanes; padded units are relu(0)=0)
    h1 = jnp.dot(x, w1_ref[...], preferred_element_type=jnp.float32) + b1_ref[...]
    h1 = jnp.maximum(h1, 0.0)

    # linear2 + ReLU
    h2 = jnp.dot(h1, w2_ref[...], preferred_element_type=jnp.float32) + b2_ref[...]
    h2 = jnp.maximum(h2, 0.0)

    # policy_layer + tanh
    pi = jnp.dot(h2, w3_ref[...], preferred_element_type=jnp.float32) + b3_ref[...]
    pi = jnp.tanh(pi)

    # rescale_function fused into one FMA: (pi+1)*(emax-emin)/2 + emin == pi*scale + shift
    out_ref[...] = pi * scale_ref[...] + shift_ref[...]


def prepare_actor_params(params):
    """One-time prep (hoisted out of the per-call path): pad weight hidden dims to 128
    lanes for the MXU and fold the tanh rescale into (scale, shift)."""
    w1, b1, w2, b2, w3, b3, emin, emax = params
    in_dim, hid = w1.shape
    out_dim = w3.shape[1]
    hid_p = _round_up(hid, LANE)

    w1p = _pad2d(jnp.asarray(w1, jnp.float32), in_dim, hid_p)
    b1p = _pad2d(jnp.asarray(b1, jnp.float32).reshape(1, hid), 1, hid_p)
    w2p = _pad2d(jnp.asarray(w2, jnp.float32), hid_p, hid_p)
    b2p = _pad2d(jnp.asarray(b2, jnp.float32).reshape(1, hid), 1, hid_p)
    w3p = _pad2d(jnp.asarray(w3, jnp.float32), hid_p, out_dim)
    b3p = jnp.asarray(b3, jnp.float32).reshape(1, out_dim)

    emin = jnp.asarray(emin, jnp.float32).reshape(1, out_dim)
    emax = jnp.asarray(emax, jnp.float32).reshape(1, out_dim)
    scale = (emax - emin) * 0.5
    shift = (emax + emin) * 0.5
    return (w1p, b1p, w2p, b2p, w3p, b3p, scale, shift)


def actor_forward(state, prepped):
    """Full actor MLP in one batch-tiled Pallas kernel (activations unpadded in HBM)."""
    w1p, b1p, w2p, b2p, w3p, b3p, scale, shift = prepped
    state = jnp.asarray(state, jnp.float32)
    batch, in_dim = state.shape
    hid_p = w1p.shape[1]
    out_dim = w3p.shape[1]

    vmem_budget = _vmem_budget_bytes()
    n_cores = _num_tensorcores()

    # Resident (grid-invariant) operands, double-buffered by default.
    resident = 4 * (in_dim * hid_p + hid_p * hid_p + hid_p * out_dim
                    + 2 * hid_p + 3 * out_dim)
    # Live bytes per batch row: double-buffered state/out DMA windows + in-kernel
    # f32 activations (h1, h2, pi).
    per_row = 4 * (2 * (in_dim + out_dim) + 2 * hid_p + out_dim)
    avail = max(vmem_budget - 2 * resident, per_row * SUBLANE)
    tb_cap = max(SUBLANE, (avail // per_row) // SUBLANE * SUBLANE)

    # One block on single-TC chips; n_cores balanced blocks on dual-TC chips so the
    # "parallel" grid axis actually shards across TensorCores.
    desired = _round_up(pl.cdiv(batch, n_cores), SUBLANE)
    tb = min(tb_cap, desired)

    batch_p = _round_up(batch, tb)
    xp = state if batch_p == batch else jnp.pad(state, ((0, batch_p - batch), (0, 0)))

    const = lambda i: (0, 0)  # grid-invariant blocks stay VMEM-resident across steps

    out = pl.pallas_call(
        actor_kernel,
        out_shape=jax.ShapeDtypeStruct((batch_p, out_dim), jnp.float32),
        grid=(batch_p // tb,),
        in_specs=[
            pl.BlockSpec((tb, in_dim), lambda i: (i, 0)),   # state: tiled over batch, unpadded lanes
            pl.BlockSpec((in_dim, hid_p), const),           # w1
            pl.BlockSpec((1, hid_p), const),                 # b1
            pl.BlockSpec((hid_p, hid_p), const),             # w2
            pl.BlockSpec((1, hid_p), const),                 # b2
            pl.BlockSpec((hid_p, out_dim), const),           # w3
            pl.BlockSpec((1, out_dim), const),               # b3
            pl.BlockSpec((1, out_dim), const),               # scale
            pl.BlockSpec((1, out_dim), const),               # shift
        ],
        out_specs=pl.BlockSpec((tb, out_dim), lambda i: (i, 0)),
        compiler_params=pltpu.CompilerParams(
            dimension_semantics=("parallel",),
            vmem_limit_bytes=vmem_budget,
        ),
    )(xp, w1p, b1p, w2p, b2p, w3p, b3p, scale, shift)

    return out if batch_p == batch else out[:batch]


def init_params(key, input_dims, hidden_dim, output_dim, env_min, env_max):
    """Deterministic init mimicking torch.nn.Linear's U(-1/sqrt(fan_in), 1/sqrt(fan_in))."""
    ks = jax.random.split(key, 6)

    def linear_init(kw, kb, fan_in, fan_out):
        bound = 1.0 / jnp.sqrt(jnp.float32(fan_in))
        # stored as (in, out) so the kernel does x @ W
        w = jax.random.uniform(kw, (fan_in, fan_out), jnp.float32, -bound, bound)
        b = jax.random.uniform(kb, (1, fan_out), jnp.float32, -bound, bound)
        return w, b

    w1, b1 = linear_init(ks[0], ks[1], input_dims, hidden_dim)
    w2, b2 = linear_init(ks[2], ks[3], hidden_dim, hidden_dim)
    w3, b3 = linear_init(ks[4], ks[5], hidden_dim, output_dim)

    emin = jnp.asarray(env_min, jnp.float32).reshape(1, output_dim)
    emax = jnp.asarray(env_max, jnp.float32).reshape(1, output_dim)
    return (w1, b1, w2, b2, w3, b3, emin, emax)


def reference_forward(state, params):
    """Pure-JAX reference of the PyTorch forward for a sanity check."""
    w1, b1, w2, b2, w3, b3, emin, emax = params
    h1 = jnp.maximum(state @ w1 + b1, 0.0)
    h2 = jnp.maximum(h1 @ w2 + b2, 0.0)
    pi = jnp.tanh(h2 @ w3 + b3)
    return (pi + 1.0) * (emax - emin) / 2.0 + emin


if __name__ == "__main__":
    batch = 256
    input_dims = 16
    hidden_dim = 32
    output_dim = 4

    key = jax.random.PRNGKey(0)
    k_state, k_params = jax.random.split(key)

    # env_bounds: per-action-dim [env_min, env_max]
    env_min = [-2.0, -1.0, -0.5, -1.5]
    env_max = [2.0, 1.0, 0.5, 1.5]

    params = init_params(k_params, input_dims, hidden_dim, output_dim,
                         env_min, env_max)
    prepped = prepare_actor_params(params)   # one-time prep, hoisted out of the call path
    state = jax.random.normal(k_state, (batch, input_dims), jnp.float32)

    out = jax.block_until_ready(actor_forward(state, prepped))
    ref = reference_forward(state, params)

    assert out.shape == (batch, output_dim)
    assert jnp.allclose(out, ref, atol=1e-5, rtol=1e-5), "mismatch vs reference"

    # TODO(synk): choose_action's numpy exploration noise / clipping and the replay
    # lists (states/actions/rewards/logpas/entropies) are host-side logic, not kernel work.
    print("KERNEL_OK")
</pallas_src>

<mosaic_0001>
module attributes {stable_mosaic.version = 11 : i64} {
  func.func @actor_kernel(%arg0: i32, %arg1: memref<256x16xf32, #tpu.memory_space<vmem>>, %arg2: memref<16x128xf32, #tpu.memory_space<vmem>>, %arg3: memref<1x128xf32, #tpu.memory_space<vmem>>, %arg4: memref<128x128xf32, #tpu.memory_space<vmem>>, %arg5: memref<1x128xf32, #tpu.memory_space<vmem>>, %arg6: memref<128x4xf32, #tpu.memory_space<vmem>>, %arg7: memref<1x4xf32, #tpu.memory_space<vmem>>, %arg8: memref<1x4xf32, #tpu.memory_space<vmem>>, %arg9: memref<1x4xf32, #tpu.memory_space<vmem>>, %arg10: memref<256x4xf32, #tpu.memory_space<vmem>>) attributes {dimension_semantics = [#tpu.dimension_semantics<parallel>], iteration_bounds = array<i64: 1>, scalar_prefetch = 0 : i64, scratch_operands = 0 : i64, tpu.core_type = #tpu.core_type<tc>, window_params = [{transform_indices = @transform_0, window_bounds = array<i64: 256, 16>}, {pipeline_mode = #tpu.pipeline_mode<synchronous>, transform_indices = @transform_1, window_bounds = array<i64: 16, 128>}, {pipeline_mode = #tpu.pipeline_mode<synchronous>, transform_indices = @transform_2, window_bounds = array<i64: 1, 128>}, {pipeline_mode = #tpu.pipeline_mode<synchronous>, transform_indices = @transform_3, window_bounds = array<i64: 128, 128>}, {pipeline_mode = #tpu.pipeline_mode<synchronous>, transform_indices = @transform_4, window_bounds = array<i64: 1, 128>}, {pipeline_mode = #tpu.pipeline_mode<synchronous>, transform_indices = @transform_5, window_bounds = array<i64: 128, 4>}, {pipeline_mode = #tpu.pipeline_mode<synchronous>, transform_indices = @transform_6, window_bounds = array<i64: 1, 4>}, {pipeline_mode = #tpu.pipeline_mode<synchronous>, transform_indices = @transform_7, window_bounds = array<i64: 1, 4>}, {pipeline_mode = #tpu.pipeline_mode<synchronous>, transform_indices = @transform_8, window_bounds = array<i64: 1, 4>}, {transform_indices = @transform_9, window_bounds = array<i64: 256, 4>}]} {
    %c0 = arith.constant 0 : index
    %c0_0 = arith.constant 0 : index
    %0 = vector.load %arg1[%c0, %c0_0] : memref<256x16xf32, #tpu.memory_space<vmem>>, vector<256x16xf32>
    %c0_1 = arith.constant 0 : index
    %c0_2 = arith.constant 0 : index
    %1 = vector.load %arg2[%c0_1, %c0_2] : memref<16x128xf32, #tpu.memory_space<vmem>>, vector<16x128xf32>
    %cst = arith.constant dense<0.000000e+00> : vector<256x128xf32>
    %2 = tpu.matmul %0, %1, %cst {dimension_numbers = #tpu.dot_dimension_numbers<[1], [0], [0], [1], [0, 0, 1, 1], [], []>} : vector<256x16xf32>, vector<16x128xf32>, vector<256x128xf32> -> vector<256x128xf32>
    %c0_3 = arith.constant 0 : index
    %c0_4 = arith.constant 0 : index
    %3 = vector.load %arg3[%c0_3, %c0_4] : memref<1x128xf32, #tpu.memory_space<vmem>>, vector<1x128xf32>
    %4 = vector.broadcast %3 : vector<1x128xf32> to vector<256x128xf32>
    %5 = arith.addf %2, %4 : vector<256x128xf32>
    %cst_5 = arith.constant 0.000000e+00 : f32
    %6 = vector.broadcast %cst_5 : f32 to vector<256x128xf32>
    %7 = arith.maximumf %5, %6 : vector<256x128xf32>
    %c0_6 = arith.constant 0 : index
    %c0_7 = arith.constant 0 : index
    %8 = vector.load %arg4[%c0_6, %c0_7] : memref<128x128xf32, #tpu.memory_space<vmem>>, vector<128x128xf32>
    %cst_8 = arith.constant dense<0.000000e+00> : vector<256x128xf32>
    %9 = tpu.matmul %7, %8, %cst_8 {dimension_numbers = #tpu.dot_dimension_numbers<[1], [0], [0], [1], [0, 0, 1, 1], [], []>} : vector<256x128xf32>, vector<128x128xf32>, vector<256x128xf32> -> vector<256x128xf32>
    %c0_9 = arith.constant 0 : index
    %c0_10 = arith.constant 0 : index
    %10 = vector.load %arg5[%c0_9, %c0_10] : memref<1x128xf32, #tpu.memory_space<vmem>>, vector<1x128xf32>
    %11 = vector.broadcast %10 : vector<1x128xf32> to vector<256x128xf32>
    %12 = arith.addf %9, %11 : vector<256x128xf32>
    %cst_11 = arith.constant 0.000000e+00 : f32
    %13 = vector.broadcast %cst_11 : f32 to vector<256x128xf32>
    %14 = arith.maximumf %12, %13 : vector<256x128xf32>
    %c0_12 = arith.constant 0 : index
    %c0_13 = arith.constant 0 : index
    %15 = vector.load %arg6[%c0_12, %c0_13] : memref<128x4xf32, #tpu.memory_space<vmem>>, vector<128x4xf32>
    %cst_14 = arith.constant dense<0.000000e+00> : vector<256x4xf32>
    %16 = tpu.matmul %14, %15, %cst_14 {dimension_numbers = #tpu.dot_dimension_numbers<[1], [0], [0], [1], [0, 0, 1, 1], [], []>} : vector<256x128xf32>, vector<128x4xf32>, vector<256x4xf32> -> vector<256x4xf32>
    %c0_15 = arith.constant 0 : index
    %c0_16 = arith.constant 0 : index
    %17 = vector.load %arg7[%c0_15, %c0_16] : memref<1x4xf32, #tpu.memory_space<vmem>>, vector<1x4xf32>
    %18 = vector.broadcast %17 : vector<1x4xf32> to vector<256x4xf32>
    %19 = arith.addf %16, %18 : vector<256x4xf32>
    %20 = math.tanh %19 : vector<256x4xf32>
    %c0_17 = arith.constant 0 : index
    %c0_18 = arith.constant 0 : index
    %21 = vector.load %arg8[%c0_17, %c0_18] : memref<1x4xf32, #tpu.memory_space<vmem>>, vector<1x4xf32>
    %22 = vector.broadcast %21 : vector<1x4xf32> to vector<256x4xf32>
    %23 = arith.mulf %20, %22 : vector<256x4xf32>
    %c0_19 = arith.constant 0 : index
    %c0_20 = arith.constant 0 : index
    %24 = vector.load %arg9[%c0_19, %c0_20] : memref<1x4xf32, #tpu.memory_space<vmem>>, vector<1x4xf32>
    %25 = vector.broadcast %24 : vector<1x4xf32> to vector<256x4xf32>
    %26 = arith.addf %23, %25 : vector<256x4xf32>
    %c0_21 = arith.constant 0 : index
    %c0_22 = arith.constant 0 : index
    %27 = vector.load %arg10[%c0_21, %c0_22] : memref<256x4xf32, #tpu.memory_space<vmem>>, vector<256x4xf32>
    tpu.vector_store %arg10[%c0_21, %c0_22], %26 {strides = array<i32>} : memref<256x4xf32, #tpu.memory_space<vmem>>, vector<256x4xf32>,
    return
  }
  func.func @transform_0(%arg0: i32) -> (i32, i32) {
    %c0_i32 = arith.constant 0 : i32
    %c0_i32_0 = arith.constant 0 : i32
    return %arg0, %c0_i32 : i32, i32
  }
  func.func @transform_1(%arg0: i32) -> (i32, i32) {
    %c0_i32 = arith.constant 0 : i32
    %c0_i32_0 = arith.constant 0 : i32
    %c0_i32_1 = arith.constant 0 : i32
    return %c0_i32, %c0_i32_0 : i32, i32
  }
  func.func @transform_2(%arg0: i32) -> (i32, i32) {
    %c0_i32 = arith.constant 0 : i32
    %c0_i32_0 = arith.constant 0 : i32
    %c0_i32_1 = arith.constant 0 : i32
    return %c0_i32, %c0_i32_0 : i32, i32
  }
  func.func @transform_3(%arg0: i32) -> (i32, i32) {
    %c0_i32 = arith.constant 0 : i32
    %c0_i32_0 = arith.constant 0 : i32
    %c0_i32_1 = arith.constant 0 : i32
    return %c0_i32, %c0_i32_0 : i32, i32
  }
  func.func @transform_4(%arg0: i32) -> (i32, i32) {
    %c0_i32 = arith.constant 0 : i32
    %c0_i32_0 = arith.constant 0 : i32
    %c0_i32_1 = arith.constant 0 : i32
    return %c0_i32, %c0_i32_0 : i32, i32
  }
  func.func @transform_5(%arg0: i32) -> (i32, i32) {
    %c0_i32 = arith.constant 0 : i32
    %c0_i32_0 = arith.constant 0 : i32
    %c0_i32_1 = arith.constant 0 : i32
    return %c0_i32, %c0_i32_0 : i32, i32
  }
  func.func @transform_6(%arg0: i32) -> (i32, i32) {
    %c0_i32 = arith.constant 0 : i32
    %c0_i32_0 = arith.constant 0 : i32
    %c0_i32_1 = arith.constant 0 : i32
    return %c0_i32, %c0_i32_0 : i32, i32
  }
  func.func @transform_7(%arg0: i32) -> (i32, i32) {
    %c0_i32 = arith.constant 0 : i32
    %c0_i32_0 = arith.constant 0 : i32
    %c0_i32_1 = arith.constant 0 : i32
    return %c0_i32, %c0_i32_0 : i32, i32
  }
  func.func @transform_8(%arg0: i32) -> (i32, i32) {
    %c0_i32 = arith.constant 0 : i32
    %c0_i32_0 = arith.constant 0 : i32
    %c0_i32_1 = arith.constant 0 : i32
    return %c0_i32, %c0_i32_0 : i32, i32
  }
  func.func @transform_9(%arg0: i32) -> (i32, i32) {
    %c0_i32 = arith.constant 0 : i32
    %c0_i32_0 = arith.constant 0 : i32
    return %arg0, %c0_i32 : i32, i32
  }
}

</mosaic_0001>

<bundles_post_ra>
// kernel: tpu_custom_call.1
= control target key start
LH: loop header
LB: loop body
LE: loop exit
PB: predicated region body
PF: predicated region fallthrough
CT: control target
= control target key end

     0   :  { %vm70_vm0 = vcmask 130048   ;;  %vm714_vm1 = vcmask 31744   ;;  %s1479_s1 = inlined_call_operand.vmem [shape: f32[16,128], index: 1, kind: input, shape index: {}]   ;;  %s1480_s0 = inlined_call_operand.vmem [shape: f32[256,16], index: 0, kind: input, shape index: {}]   ;;  %s1481_s2 = inlined_call_operand.vmem [shape: f32[1,128], index: 2, kind: input, shape index: {}]   ;;  %s1482_s3 = inlined_call_operand.vmem [shape: f32[128,128], index: 3, kind: input, shape index: {}]   ;;  %s1483_s4 = inlined_call_operand.vmem [shape: f32[1,128], index: 4, kind: input, shape index: {}]   ;;  %s1484_s5 = inlined_call_operand.vmem [shape: f32[128,4], index: 5, kind: input, shape index: {}]   ;;  %s1485_s6 = inlined_call_operand.vmem [shape: f32[1,4], index: 6, kind: input, shape index: {}]   ;;  %s1486_s7 = inlined_call_operand.vmem [shape: f32[1,4], index: 7, kind: input, shape index: {}]   ;;  %s1487_s8 = inlined_call_operand.vmem [shape: f32[1,4], index: 8, kind: input, shape index: {}]   ;;  %s1488_s9 = inlined_call_operand.vmem [shape: f32[256,4], index: 9, kind: output, shape index: {}]  }
   0x1   :  { %v65_v0 = vld [vmem:[%s1479_s1 + $0x8] sm:$0xff]  ;;  %v64_v1 = vld [vmem:[%s1479_s1] sm:$0xff]  ;;  %v34_v4 = vld [vmem:[%s1480_s0 + $0x10] sm:$0xff] }
   0x2   :  { %181 = vmatpush.msra.mxu0 %v65_v0  ;;  %v32_v2 = vld [vmem:[%s1480_s0] sm:$0xff]  ;;  %783 = vmatpush.msra.mxu3 %v65_v0  ;;  %v33_v3 = vld [vmem:[%s1480_s0 + $0x8] sm:$0xff]  ;;  %v35_v5 = vld [vmem:[%s1480_s0 + $0x18] sm:$0xff] }
   0x3   :  { %v36_v6 = vld [vmem:[%s1480_s0 + $0x20] sm:$0xff]  ;;  %v37_v7 = vld [vmem:[%s1480_s0 + $0x28] sm:$0xff]  ;;  %v38_v8 = vld [vmem:[%s1480_s0 + $0x30] sm:$0xff] }
   0x4   :  { %182 = vmatpush.msra.mxu0 %v64_v1  ;;  %784 = vmatpush.msra.mxu3 %v64_v1  ;;  %v39_v9 = vld [vmem:[%s1480_s0 + $0x38] sm:$0xff]  ;;  %v40_v10 = vld [vmem:[%s1480_s0 + $0x40] sm:$0xff]  ;;  %v326_v12 = vld [vmem:[%s1482_s3 + $0x70] sm:$0xff] }
   0x5   :  { %751 = vmatmul.msk.f32.vlgmr.msra.gmra.mxu0 %vm70_vm0, %v32_v2  ;;  %v327_v11 = vld [vmem:[%s1482_s3 + $0x78] sm:$0xff]  ;;  %v325_v13 = vld [vmem:[%s1482_s3 + $0x68] sm:$0xff]  ;;  %v324_v15 = vld [vmem:[%s1482_s3 + $0x60] sm:$0xff] }
   0x6   :  { %332 = vmatpush.msra.mxu1 %v327_v11  ;;  %785 = vmatpush.msrb.mxu3 %v327_v11  ;;  %v41_v14 = vld [vmem:[%s1480_s0 + $0x48] sm:$0xff]  ;;  %v323_v16 = vld [vmem:[%s1482_s3 + $0x58] sm:$0xff]  ;;  %v322_v17 = vld [vmem:[%s1482_s3 + $0x50] sm:$0xff] }
   0x7   :  { %v321_v18 = vld [vmem:[%s1482_s3 + $0x48] sm:$0xff]  ;;  %v42_v19 = vld [vmem:[%s1480_s0 + $0x50] sm:$0xff]  ;;  %v320_v20 = vld [vmem:[%s1482_s3 + $0x40] sm:$0xff] }
   0x8   :  { %333 = vmatpush.msra.mxu1 %v326_v12  ;;  %786 = vmatpush.msrb.mxu3 %v326_v12  ;;  %v319_v21 = vld [vmem:[%s1482_s3 + $0x38] sm:$0xff]  ;;  %v318_v22 = vld [vmem:[%s1482_s3 + $0x30] sm:$0xff]  ;;  %v317_v23 = vld [vmem:[%s1482_s3 + $0x28] sm:$0xff] }
   0x9   :  { %v43_v24 = vld [vmem:[%s1480_s0 + $0x58] sm:$0xff]  ;;  %v316_v25 = vld [vmem:[%s1482_s3 + $0x20] sm:$0xff]  ;;  %v314_v27 = vld [vmem:[%s1482_s3 + $0x10] sm:$0xff] }
   0xa   :  { %334 = vmatpush.msra.mxu1 %v325_v13  ;;  %787 = vmatpush.msrb.mxu3 %v325_v13  ;;  %v315_v26 = vld [vmem:[%s1482_s3 + $0x18] sm:$0xff]  ;;  %v44_v28 = vld [vmem:[%s1480_s0 + $0x60] sm:$0xff]  ;;  %v313_v29 = vld [vmem:[%s1482_s3 + $0x8] sm:$0xff] }
   0xb   :  { %v312_v30 = vld [vmem:[%s1482_s3] sm:$0xff]  ;;  %v45_v31 = vld [vmem:[%s1480_s0 + $0x68] sm:$0xff]  ;;  %v46_v32 = vld [vmem:[%s1480_s0 + $0x70] sm:$0xff] }
   0xc   :  { %335 = vmatpush.msra.mxu1 %v324_v15  ;;  %788 = vmatpush.msrb.mxu3 %v324_v15  ;;  %v47_v33 = vld [vmem:[%s1480_s0 + $0x78] sm:$0xff]  ;;  %v1057_v34 = vld [vmem:[%s1481_s2] ss:$0 sm:$0xff]  ;;  %v49_v40 = vld [vmem:[%s1480_s0 + $0x88] sm:$0xff] }
   0xd   :  { %752 = vmatmul.msk.f32.gmra.mxu0 %vm70_vm0, %v33_v3  ;;  %v48_v36 = vld [vmem:[%s1480_s0 + $0x80] sm:$0xff]  ;;  %v50_v44 = vld [vmem:[%s1480_s0 + $0x90] sm:$0xff]  ;;  %v51_v48 = vld [vmem:[%s1480_s0 + $0x98] sm:$0xff] }
   0xe   :  { %336 = vmatpush.msra.mxu1 %v323_v16  ;;  %789 = vmatpush.msrb.mxu3 %v323_v16  ;;  %v52_v52 = vld [vmem:[%s1480_s0 + $0xa0] sm:$0xff]  ;;  %v53_v56 = vld [vmem:[%s1480_s0 + $0xa8] sm:$0xff]  ;;  %v58_v59 = vld [vmem:[%s1480_s0 + $0xd0] sm:$0xff] }
   0xf   :  { %777 = vmatmul.msk.f32.vlgmr.msra.gmra.mxu3 %vm70_vm0, %v58_v59  ;;  %v54_v61 = vld [vmem:[%s1480_s0 + $0xb0] sm:$0xff]  ;;  %v59_v0 = vld [vmem:[%s1480_s0 + $0xd8] sm:$0xff]  ;;  %v57_v13 = vld [vmem:[%s1480_s0 + $0xc8] sm:$0xff] }
  0x10   :  { %337 = vmatpush.msra.mxu1 %v322_v17  ;;  %790 = vmatpush.msrb.mxu3 %v322_v17  ;;  %v55_v2 = vld [vmem:[%s1480_s0 + $0xb8] sm:$0xff]  ;;  %v491_v15 = vld [vmem:[%s1484_s5 + $0x70] sm:$0xff]  ;;  %v490_v17 = vld [vmem:[%s1484_s5 + $0x68] sm:$0xff] }
  0x11   :  { %v492_v11 = vld [vmem:[%s1484_s5 + $0x78] sm:$0xff] }
  0x12   :  { %338 = vmatpush.msra.mxu1 %v321_v18  ;;  %791 = vmatpush.msrb.mxu3 %v321_v18  ;;  %v62_v18 = vld [vmem:[%s1480_s0 + $0xf0] sm:$0xff] }
  0x13   :  { %497 = vmatpush.msra.mxu2 %v492_v11 }
  0x14   :  { %339 = vmatpush.msra.mxu1 %v320_v20  ;;  %792 = vmatpush.msrb.mxu3 %v320_v20  ;;  %v488_v20 = vld [vmem:[%s1484_s5 + $0x58] sm:$0xff] }
  0x15   :  { %753 = vmatmul.msk.f32.gmra.mxu0 %vm70_vm0, %v34_v4  ;;  %498 = vmatpush.msra.mxu2 %v491_v15 }
  0x16   :  { %340 = vmatpush.msra.mxu1 %v319_v21  ;;  %793 = vmatpush.msrb.mxu3 %v319_v21 }
  0x17   :  { %778 = vmatmul.msk.f32.gmra.mxu3 %vm70_vm0, %v59_v0  ;;  %499 = vmatpush.msra.mxu2 %v490_v17 }
  0x18   :  { %341 = vmatpush.msra.mxu1 %v318_v22  ;;  %794 = vmatpush.msrb.mxu3 %v318_v22 }
  0x1a   :  { %342 = vmatpush.msra.mxu1 %v317_v23  ;;  %795 = vmatpush.msrb.mxu3 %v317_v23  ;;  %v487_v23 = vld [vmem:[%s1484_s5 + $0x50] sm:$0xff] }
  0x1c   :  { %343 = vmatpush.msra.mxu1 %v316_v25  ;;  %796 = vmatpush.msrb.mxu3 %v316_v25  ;;  %v486_v25 = vld [vmem:[%s1484_s5 + $0x48] sm:$0xff] }
  0x1d   :  { %754 = vmatmul.msk.f32.gmra.mxu0 %vm70_vm0, %v35_v5  ;;  %v60_v5 = vld [vmem:[%s1480_s0 + $0xe0] sm:$0xff] }
  0x1e   :  { %344 = vmatpush.msra.mxu1 %v315_v26  ;;  %797 = vmatpush.msrb.mxu3 %v315_v26  ;;  %v63_v26 = vld [vmem:[%s1480_s0 + $0xf8] sm:$0xff] }
  0x1f   :  { %779 = vmatmul.msk.f32.gmra.mxu3 %vm70_vm0, %v60_v5 }
  0x20   :  { %345 = vmatpush.msra.mxu1 %v314_v27  ;;  %798 = vmatpush.msrb.mxu3 %v314_v27  ;;  %v485_v27 = vld [vmem:[%s1484_s5 + $0x40] sm:$0xff] }
  0x22   :  { %346 = vmatpush.msra.mxu1 %v313_v29  ;;  %799 = vmatpush.msrb.mxu3 %v313_v29 }
  0x24   :  { %347 = vmatpush.msra.mxu1 %v312_v30  ;;  %800 = vmatpush.msrb.mxu3 %v312_v30 }
  0x25   :  { %755 = vmatmul.msk.f32.gmra.mxu0 %vm70_vm0, %v36_v6 }
  0x26   :  { %801 = vmatpush.msra.mxu3 %v492_v11 }
  0x28   :  { %802 = vmatpush.msra.mxu3 %v491_v15 }
  0x2a   :  { %803 = vmatpush.msra.mxu3 %v490_v17 }
  0x2d   :  { %756 = vmatmul.msk.f32.gmra.mxu0 %vm70_vm0, %v37_v7  ;;  %v56_v7 = vld [vmem:[%s1480_s0 + $0xc0] sm:$0xff] }
  0x35   :  { %757 = vmatmul.msk.f32.gmra.mxu0 %vm70_vm0, %v38_v8 }
  0x3d   :  { %758 = vmatmul.msk.f32.gmra.mxu0 %vm70_vm0, %v39_v9 }
  0x45   :  { %759 = vmatmul.msk.f32.gmra.mxu0 %vm70_vm0, %v40_v10  ;;  %v61_v10 = vld [vmem:[%s1480_s0 + $0xe8] sm:$0xff] }
  0x46   :  { %780 = vmatmul.msk.f32.gmra.mxu3 %vm70_vm0, %v61_v10 }
  0x4d   :  { %760 = vmatmul.msk.f32.gmra.mxu0 %vm70_vm0, %v41_v14 }
  0x4e   :  { %781 = vmatmul.msk.f32.gmra.mxu3 %vm70_vm0, %v62_v18 }
  0x55   :  { %761 = vmatmul.msk.f32.gmra.mxu0 %vm70_vm0, %v42_v19  ;;  %v489_v19 = vld [vmem:[%s1484_s5 + $0x60] sm:$0xff] }
  0x56   :  { %500 = vmatpush.msra.mxu2 %v489_v19  ;;  %804 = vmatpush.msra.mxu3 %v489_v19 }
  0x57   :  { %782 = vmatmul.msk.f32.gmra.mxu3 %vm70_vm0, %v63_v26 }
  0x58   :  { %501 = vmatpush.msra.mxu2 %v488_v20  ;;  %805 = vmatpush.msra.mxu3 %v488_v20 }
  0x5a   :  { %502 = vmatpush.msra.mxu2 %v487_v23  ;;  %806 = vmatpush.msra.mxu3 %v487_v23 }
  0x5c   :  { %503 = vmatpush.msra.mxu2 %v486_v25  ;;  %807 = vmatpush.msra.mxu3 %v486_v25 }
  0x5d   :  { %762 = vmatmul.msk.f32.gmra.mxu0 %vm70_vm0, %v43_v24 }
  0x5e   :  { %504 = vmatpush.msra.mxu2 %v485_v27  ;;  %808 = vmatpush.msra.mxu3 %v485_v27 }
  0x65   :  { %763 = vmatmul.msk.f32.gmra.mxu0 %vm70_vm0, %v44_v28  ;;  %v484_v28 = vld [vmem:[%s1484_s5 + $0x38] sm:$0xff] }
  0x66   :  { %505 = vmatpush.msra.mxu2 %v484_v28  ;;  %809 = vmatpush.msra.mxu3 %v484_v28 }
  0x6d   :  { %764 = vmatmul.msk.f32.gmra.mxu0 %vm70_vm0, %v45_v31  ;;  %v483_v31 = vld [vmem:[%s1484_s5 + $0x30] sm:$0xff] }
  0x6e   :  { %506 = vmatpush.msra.mxu2 %v483_v31  ;;  %810 = vmatpush.msra.mxu3 %v483_v31 }
  0x75   :  { %765 = vmatmul.msk.f32.gmra.mxu0 %vm70_vm0, %v46_v32 }
  0x7d   :  { %766 = vmatmul.msk.f32.gmra.mxu0 %vm70_vm0, %v47_v33  ;;  %v482_v33 = vld [vmem:[%s1484_s5 + $0x28] sm:$0xff] }
  0x7e   :  { %507 = vmatpush.msra.mxu2 %v482_v33  ;;  %811 = vmatpush.msra.mxu3 %v482_v33 }
  0x82   :  { %v184_v35 = vpop.f32.mrf.mxu0 }
  0x83   :  { %v185_v37 = vadd.f32 %v1057_v34, %v184_v35  ;;  %v481_v35 = vld [vmem:[%s1484_s5 + $0x20] sm:$0xff] }
  0x84   :  { %508 = vmatpush.msra.mxu2 %v481_v35  ;;  %812 = vmatpush.msra.mxu3 %v481_v35 }
  0x85   :  { %767 = vmatmul.msk.f32.gmra.mxu0 %vm70_vm0, %v48_v36  ;;  %v280_v38 = vmax.f32 %v185_v37, 0.0  ;;  %v480_v36 = vld [vmem:[%s1484_s5 + $0x18] sm:$0xff] }
  0x86   :  { %509 = vmatpush.msra.mxu2 %v480_v36  ;;  %813 = vmatpush.msra.mxu3 %v480_v36 }
  0x87   :  { %348 = vmatmul.f32.vlgmr.msra.gmra.mxu1 %v280_v38 }
  0x8a   :  { %v187_v39 = vpop.f32.mrf.mxu0 }
  0x8b   :  { %v188_v41 = vadd.f32 %v1057_v34, %v187_v39  ;;  %v479_v39 = vld [vmem:[%s1484_s5 + $0x10] sm:$0xff] }
  0x8c   :  { %510 = vmatpush.msra.mxu2 %v479_v39  ;;  %814 = vmatpush.msra.mxu3 %v479_v39 }
  0x8d   :  { %768 = vmatmul.msk.f32.gmra.mxu0 %vm70_vm0, %v49_v40  ;;  %v281_v42 = vmax.f32 %v188_v41, 0.0  ;;  %v478_v41 = vld [vmem:[%s1484_s5 + $0x8] sm:$0xff] }
  0x8e   :  { %511 = vmatpush.msra.mxu2 %v478_v41  ;;  %815 = vmatpush.msra.mxu3 %v478_v41 }
  0x8f   :  { %351 = vmatmul.f32.gmra.mxu1 %v281_v42  ;;  %v477_v42 = vld [vmem:[%s1484_s5] sm:$0xff] }
  0x90   :  { %512 = vmatpush.msra.mxu2 %v477_v42  ;;  %816 = vmatpush.msra.mxu3 %v477_v42 }
  0x92   :  { %v190_v43 = vpop.f32.mrf.mxu0  ;;  %v262_v39 = vpop.f32.mrf.mxu3 }
  0x93   :  { %v191_v45 = vadd.f32 %v1057_v34, %v190_v43 }
  0x95   :  { %v282_v46 = vmax.f32 %v191_v45, 0.0  ;;  %769 = vmatmul.msk.f32.gmra.mxu0 %vm70_vm0, %v50_v44 }
  0x97   :  { %354 = vmatmul.f32.gmra.mxu1 %v282_v46 }
  0x9a   :  { %v193_v47 = vpop.f32.mrf.mxu0 }
  0x9b   :  { %v194_v49 = vadd.f32 %v1057_v34, %v193_v47 }
  0x9d   :  { %v283_v50 = vmax.f32 %v194_v49, 0.0  ;;  %770 = vmatmul.msk.f32.gmra.mxu0 %vm70_vm0, %v51_v48 }
  0x9f   :  { %357 = vmatmul.f32.gmra.mxu1 %v283_v50 }
  0xa2   :  { %v196_v51 = vpop.f32.mrf.mxu0 }
  0xa3   :  { %v197_v53 = vadd.f32 %v1057_v34, %v196_v51 }
  0xa5   :  { %v284_v54 = vmax.f32 %v197_v53, 0.0  ;;  %771 = vmatmul.msk.f32.gmra.mxu0 %vm70_vm0, %v52_v52  ;;  %v1190_v52 = vld [vmem:[%s1483_s4] ss:$0 sm:$0xff] }
  0xa7   :  { %360 = vmatmul.f32.gmra.mxu1 %v284_v54 }
  0xaa   :  { %v199_v55 = vpop.f32.mrf.mxu0 }
  0xab   :  { %v200_v57 = vadd.f32 %v1057_v34, %v199_v55 }
  0xad   :  { %v285_v58 = vmax.f32 %v200_v57, 0.0  ;;  %772 = vmatmul.msk.f32.gmra.mxu0 %vm70_vm0, %v53_v56 }
  0xaf   :  { %363 = vmatmul.f32.gmra.mxu1 %v285_v58 }
  0xb2   :  { %v202_v60 = vpop.f32.mrf.mxu0 }
  0xb3   :  { %v203_v62 = vadd.f32 %v1057_v34, %v202_v60 }
  0xb5   :  { %v286_v63 = vmax.f32 %v203_v62, 0.0  ;;  %773 = vmatmul.msk.f32.gmra.mxu0 %vm70_vm0, %v54_v61 }
  0xb7   :  { %366 = vmatmul.f32.gmra.mxu1 %v286_v63 }
  0xba   :  { %v205_v1 = vpop.f32.mrf.mxu0 }
  0xbb   :  { %v206_v3 = vadd.f32 %v1057_v34, %v205_v1 }
  0xbd   :  { %v287_v4 = vmax.f32 %v206_v3, 0.0  ;;  %774 = vmatmul.msk.f32.gmra.mxu0 %vm70_vm0, %v55_v2 }
  0xbf   :  { %369 = vmatmul.f32.gmra.mxu1 %v287_v4 }
  0xc2   :  { %v208_v6 = vpop.f32.mrf.mxu0 }
  0xc3   :  { %v209_v8 = vadd.f32 %v1057_v34, %v208_v6 }
  0xc5   :  { %v288_v9 = vmax.f32 %v209_v8, 0.0  ;;  %775 = vmatmul.msk.f32.gmra.mxu0 %vm70_vm0, %v56_v7 }
  0xc7   :  { %372 = vmatmul.f32.gmra.mxu1 %v288_v9 }
  0xca   :  { %v211_v12 = vpop.f32.mrf.mxu0 }
  0xcb   :  { %v212_v14 = vadd.f32 %v1057_v34, %v211_v12 }
  0xcd   :  { %v289_v16 = vmax.f32 %v212_v14, 0.0  ;;  %776 = vmatmul.msk.f32.gmra.mxu0 %vm70_vm0, %v57_v13 }
  0xcf   :  { %375 = vmatmul.f32.gmra.mxu1 %v289_v16 }
  0xd2   :  { %v214_v21 = vpop.f32.mrf.mxu0 }
  0xd3   :  { %v215_v22 = vadd.f32 %v1057_v34, %v214_v21 }
  0xd5   :  { %v290_v24 = vmax.f32 %v215_v22, 0.0 }
  0xd7   :  { %378 = vmatmul.f32.gmra.mxu1 %v290_v24 }
  0xda   :  { %v217_v29 = vpop.f32.mrf.mxu0 }
  0xdb   :  { %v218_v30 = vadd.f32 %v1057_v34, %v217_v29 }
  0xdd   :  { %v291_v32 = vmax.f32 %v218_v30, 0.0 }
  0xdf   :  { %381 = vmatmul.f32.gmra.mxu1 %v291_v32 }
  0xe2   :  { %v220_v37 = vpop.f32.mrf.mxu0 }
  0xe3   :  { %v221_v38 = vadd.f32 %v1057_v34, %v220_v37 }
  0xe5   :  { %v292_v40 = vmax.f32 %v221_v38, 0.0 }
  0xe7   :  { %384 = vmatmul.f32.gmra.mxu1 %v292_v40 }
  0xea   :  { %v223_v43 = vpop.f32.mrf.mxu0 }
  0xeb   :  { %v224_v44 = vadd.f32 %v1057_v34, %v223_v43 }
  0xed   :  { %v293_v45 = vmax.f32 %v224_v44, 0.0 }
  0xef   :  { %387 = vmatmul.f32.gmra.mxu1 %v293_v45 }
  0xf2   :  { %v226_v46 = vpop.f32.mrf.mxu0 }
  0xf3   :  { %v227_v47 = vadd.f32 %v1057_v34, %v226_v46 }
  0xf5   :  { %v294_v48 = vmax.f32 %v227_v47, 0.0 }
  0xf7   :  { %390 = vmatmul.f32.gmra.mxu1 %v294_v48  ;;  %v265_v48 = vpop.f32.mrf.mxu3 }
  0xfa   :  { %v229_v49 = vpop.f32.mrf.mxu0 }
  0xfb   :  { %v230_v50 = vadd.f32 %v1057_v34, %v229_v49 }
  0xfd   :  { %v295_v51 = vmax.f32 %v230_v50, 0.0 }
  0xff   :  { %393 = vmatmul.f32.gmra.mxu1 %v295_v51 }
 0x102   :  { %v232_v53 = vpop.f32.mrf.mxu0 }
 0x103   :  { %v233_v54 = vadd.f32 %v1057_v34, %v232_v53  ;;  %v263_v53 = vadd.f32 %v1057_v34, %v262_v39 }
 0x104   :  { %v349_v55 = vpop.f32.mrf.mxu1 }
 0x105   :  { %v296_v56 = vmax.f32 %v233_v54, 0.0  ;;  %v350_v57 = vadd.f32 %v1190_v52, %v349_v55  ;;  %v306_v54 = vmax.f32 %v263_v53, 0.0 }
 0x107   :  { %v445_v58 = vmax.f32 %v350_v57, 0.0  ;;  %396 = vmatmul.f32.gmra.mxu1 %v296_v56  ;;  %v268_v57 = vpop.f32.mrf.mxu3 }
 0x109   :  { %513 = vmatmul.f32.vlgmr.msra.gmra.mxu2 %v445_v58 }
 0x10a   :  { %v235_v59 = vpop.f32.mrf.mxu0 }
 0x10b   :  { %v236_v60 = vadd.f32 %v1057_v34, %v235_v59  ;;  %v266_v59 = vadd.f32 %v1057_v34, %v265_v48 }
 0x10c   :  { %v352_v61 = vpop.f32.mrf.mxu1 }
 0x10d   :  { %v297_v62 = vmax.f32 %v236_v60, 0.0  ;;  %v353_v63 = vadd.f32 %v1190_v52, %v352_v61  ;;  %v307_v60 = vmax.f32 %v266_v59, 0.0 }
 0x10f   :  { %v446_v0 = vmax.f32 %v353_v63, 0.0  ;;  %399 = vmatmul.f32.gmra.mxu1 %v297_v62 }
 0x111   :  { %516 = vmatmul.f32.gmra.mxu2 %v446_v0  ;;  %v269_v0 = vadd.f32 %v1057_v34, %v268_v57 }
 0x112   :  { %v238_v1 = vpop.f32.mrf.mxu0 }
 0x113   :  { %v239_v2 = vadd.f32 %v1057_v34, %v238_v1  ;;  %v271_v1 = vpop.f32.mrf.mxu3 }
 0x114   :  { %v355_v3 = vpop.f32.mrf.mxu1 }
 0x115   :  { %v298_v4 = vmax.f32 %v239_v2, 0.0  ;;  %v356_v5 = vadd.f32 %v1190_v52, %v355_v3  ;;  %v308_v2 = vmax.f32 %v269_v0, 0.0 }
 0x117   :  { %v447_v6 = vmax.f32 %v356_v5, 0.0  ;;  %402 = vmatmul.f32.gmra.mxu1 %v298_v4 }
 0x119   :  { %519 = vmatmul.f32.gmra.mxu2 %v447_v6  ;;  %v272_v6 = vadd.f32 %v1057_v34, %v271_v1 }
 0x11a   :  { %v241_v7 = vpop.f32.mrf.mxu0 }
 0x11b   :  { %v242_v8 = vadd.f32 %v1057_v34, %v241_v7  ;;  %v274_v7 = vpop.f32.mrf.mxu3 }
 0x11c   :  { %v358_v9 = vpop.f32.mrf.mxu1 }
 0x11d   :  { %v299_v10 = vmax.f32 %v242_v8, 0.0  ;;  %v359_v11 = vadd.f32 %v1190_v52, %v358_v9  ;;  %v309_v8 = vmax.f32 %v272_v6, 0.0 }
 0x11f   :  { %v448_v12 = vmax.f32 %v359_v11, 0.0  ;;  %405 = vmatmul.f32.gmra.mxu1 %v299_v10 }
 0x121   :  { %522 = vmatmul.f32.gmra.mxu2 %v448_v12  ;;  %v275_v12 = vadd.f32 %v1057_v34, %v274_v7 }
 0x122   :  { %v244_v13 = vpop.f32.mrf.mxu0 }
 0x123   :  { %v245_v14 = vadd.f32 %v1057_v34, %v244_v13  ;;  %v310_v13 = vmax.f32 %v275_v12, 0.0 }
 0x124   :  { %v361_v15 = vpop.f32.mrf.mxu1 }
 0x125   :  { %v300_v16 = vmax.f32 %v245_v14, 0.0  ;;  %v362_v17 = vadd.f32 %v1190_v52, %v361_v15  ;;  %v277_v15 = vpop.f32.mrf.mxu3 }
 0x127   :  { %v449_v18 = vmax.f32 %v362_v17, 0.0  ;;  %408 = vmatmul.f32.gmra.mxu1 %v300_v16 }
 0x129   :  { %525 = vmatmul.f32.gmra.mxu2 %v449_v18  ;;  %v278_v18 = vadd.f32 %v1057_v34, %v277_v15 }
 0x12a   :  { %v247_v19 = vpop.f32.mrf.mxu0 }
 0x12b   :  { %v248_v20 = vadd.f32 %v1057_v34, %v247_v19  ;;  %v311_v19 = vmax.f32 %v278_v18, 0.0 }
 0x12c   :  { %v364_v21 = vpop.f32.mrf.mxu1 }
 0x12d   :  { %v301_v22 = vmax.f32 %v248_v20, 0.0  ;;  %v365_v23 = vadd.f32 %v1190_v52, %v364_v21 }
 0x12f   :  { %v450_v24 = vmax.f32 %v365_v23, 0.0  ;;  %411 = vmatmul.f32.gmra.mxu1 %v301_v22 }
 0x131   :  { %528 = vmatmul.f32.gmra.mxu2 %v450_v24 }
 0x132   :  { %v250_v25 = vpop.f32.mrf.mxu0 }
 0x133   :  { %v251_v26 = vadd.f32 %v1057_v34, %v250_v25 }
 0x134   :  { %v367_v27 = vpop.f32.mrf.mxu1 }
 0x135   :  { %v302_v28 = vmax.f32 %v251_v26, 0.0  ;;  %v368_v29 = vadd.f32 %v1190_v52, %v367_v27  ;;  %v1228_v26 = vld [vmem:[%s1485_s6] ss:$0 sm:$0xff] }
 0x137   :  { %v451_v30 = vmax.f32 %v368_v29, 0.0  ;;  %414 = vmatmul.f32.gmra.mxu1 %v302_v28 }
 0x139   :  { %531 = vmatmul.f32.gmra.mxu2 %v451_v30 }
 0x13a   :  { %v253_v31 = vpop.f32.mrf.mxu0 }
 0x13b   :  { %v254_v32 = vadd.f32 %v1057_v34, %v253_v31  ;;  %v1235_v31 = vld [vmem:[%s1486_s7] ss:$0 sm:$0xff] }
 0x13c   :  { %v370_v33 = vpop.f32.mrf.mxu1 }
 0x13d   :  { %v303_v35 = vmax.f32 %v254_v32, 0.0  ;;  %v371_v36 = vadd.f32 %v1190_v52, %v370_v33  ;;  %v1240_v32 = vld [vmem:[%s1487_s8] ss:$0 sm:$0xff] }
 0x13f   :  { %v452_v37 = vmax.f32 %v371_v36, 0.0  ;;  %417 = vmatmul.f32.gmra.mxu1 %v303_v35 }
 0x141   :  { %534 = vmatmul.f32.gmra.mxu2 %v452_v37 }
 0x142   :  { %v256_v38 = vpop.f32.mrf.mxu0 }
 0x143   :  { %v257_v40 = vadd.f32 %v1057_v34, %v256_v38 }
 0x144   :  { %v373_v41 = vpop.f32.mrf.mxu1 }
 0x145   :  { %v304_v42 = vmax.f32 %v257_v40, 0.0  ;;  %v374_v43 = vadd.f32 %v1190_v52, %v373_v41 }
 0x147   :  { %v453_v44 = vmax.f32 %v374_v43, 0.0  ;;  %420 = vmatmul.f32.vlgmr.msrb.gmra.mxu3 %v304_v42 }
 0x149   :  { %537 = vmatmul.f32.gmra.mxu2 %v453_v44 }
 0x14a   :  { %v259_v45 = vpop.f32.mrf.mxu0 }
 0x14b   :  { %v260_v46 = vadd.f32 %v1057_v34, %v259_v45 }
 0x14c   :  { %v376_v47 = vpop.f32.mrf.mxu1 }
 0x14d   :  { %v305_v49 = vmax.f32 %v260_v46, 0.0  ;;  %v377_v50 = vadd.f32 %v1190_v52, %v376_v47 }
 0x14f   :  { %v454_v51 = vmax.f32 %v377_v50, 0.0  ;;  %423 = vmatmul.f32.gmra.mxu3 %v305_v49 }
 0x151   :  { %540 = vmatmul.f32.gmra.mxu2 %v454_v51 }
 0x154   :  { %v379_v55 = vpop.f32.mrf.mxu1 }
 0x155   :  { %v380_v56 = vadd.f32 %v1190_v52, %v379_v55 }
 0x157   :  { %v455_v58 = vmax.f32 %v380_v56, 0.0  ;;  %426 = vmatmul.f32.gmra.mxu3 %v306_v54 }
 0x159   :  { %543 = vmatmul.f32.gmra.mxu2 %v455_v58 }
 0x15c   :  { %v382_v61 = vpop.f32.mrf.mxu1 }
 0x15d   :  { %v383_v62 = vadd.f32 %v1190_v52, %v382_v61 }
 0x15f   :  { %v456_v63 = vmax.f32 %v383_v62, 0.0  ;;  %429 = vmatmul.f32.gmra.mxu3 %v307_v60 }
 0x161   :  { %546 = vmatmul.f32.gmra.mxu2 %v456_v63 }
 0x164   :  { %v385_v3 = vpop.f32.mrf.mxu1 }
 0x165   :  { %v386_v4 = vadd.f32 %v1190_v52, %v385_v3 }
 0x167   :  { %v457_v5 = vmax.f32 %v386_v4, 0.0  ;;  %432 = vmatmul.f32.gmra.mxu3 %v308_v2 }
 0x169   :  { %549 = vmatmul.f32.gmra.mxu2 %v457_v5 }
 0x16c   :  { %v388_v9 = vpop.f32.mrf.mxu1 }
 0x16d   :  { %v389_v10 = vadd.f32 %v1190_v52, %v388_v9 }
 0x16f   :  { %v458_v11 = vmax.f32 %v389_v10, 0.0  ;;  %435 = vmatmul.f32.gmra.mxu3 %v309_v8 }
 0x171   :  { %552 = vmatmul.f32.gmra.mxu2 %v458_v11 }
 0x174   :  { %v391_v14 = vpop.f32.mrf.mxu1 }
 0x175   :  { %v392_v16 = vadd.f32 %v1190_v52, %v391_v14 }
 0x177   :  { %v459_v17 = vmax.f32 %v392_v16, 0.0  ;;  %438 = vmatmul.f32.gmra.mxu3 %v310_v13 }
 0x179   :  { %555 = vmatmul.f32.gmra.mxu2 %v459_v17 }
 0x17c   :  { %v394_v20 = vpop.f32.mrf.mxu1 }
 0x17d   :  { %v395_v21 = vadd.f32 %v1190_v52, %v394_v20 }
 0x17f   :  { %v460_v22 = vmax.f32 %v395_v21, 0.0  ;;  %441 = vmatmul.f32.gmra.mxu3 %v311_v19 }
 0x181   :  { %558 = vmatmul.f32.gmra.mxu2 %v460_v22 }
 0x184   :  { %v397_v23 = vpop.f32.mrf.mxu1 }
 0x185   :  { %v398_v24 = vadd.f32 %v1190_v52, %v397_v23 }
 0x187   :  { %v461_v25 = vmax.f32 %v398_v24, 0.0 }
 0x189   :  { %561 = vmatmul.f32.gmra.mxu2 %v461_v25 }
 0x18c   :  { %v400_v27 = vpop.f32.mrf.mxu1  ;;  %v514_v34 = vpop.f32.mrf.mxu2 }
 0x18d   :  { %v401_v28 = vadd.f32 %v1190_v52, %v400_v27  ;;  %v515_v29 = vadd.f32 %v1228_v26, %v514_v34 }
 0x18f   :  { %v462_v30 = vmax.f32 %v401_v28, 0.0  ;;  %822 = vtanh.f32 %v515_v29 }
 0x191   :  { %564 = vmatmul.f32.gmra.mxu2 %v462_v30 }
 0x194   :  { %v403_v33 = vpop.f32.mrf.mxu1  ;;  %v517_v35 = vpop.f32.mrf.mxu2 }
 0x195   :  { %v823_v36 = vpop.eup %822  ;;  %v404_v37 = vadd.f32 %v1190_v52, %v403_v33  ;;  %v518_v38 = vadd.f32 %v1228_v26, %v517_v35 }
 0x196   :  { %v646_v39 = vmul.f32 %v823_v36, %v1235_v31 }
 0x197   :  { %v463_v40 = vmax.f32 %v404_v37, 0.0  ;;  %824 = vtanh.f32 %v518_v38 }
 0x198   :  { %v682_v41 = vadd.f32 %v1240_v32, %v646_v39 }
 0x199   :  { %567 = vmatmul.f32.gmra.mxu2 %v463_v40 }
 0x19a   :  { %715 = vst.msk [vmem:[%s1488_s9] sm:$0xff] %vm714_vm1, %v682_v41 }
 0x19c   :  { %v406_v42 = vpop.f32.mrf.mxu1  ;;  %v520_v43 = vpop.f32.mrf.mxu2 }
 0x19d   :  { %v825_v44 = vpop.eup %824  ;;  %v407_v45 = vadd.f32 %v1190_v52, %v406_v42  ;;  %v521_v46 = vadd.f32 %v1228_v26, %v520_v43 }
 0x19e   :  { %v647_v47 = vmul.f32 %v825_v44, %v1235_v31 }
 0x19f   :  { %v464_v48 = vmax.f32 %v407_v45, 0.0  ;;  %826 = vtanh.f32 %v521_v46 }
 0x1a0   :  { %v683_v49 = vadd.f32 %v1240_v32, %v647_v47 }
 0x1a1   :  { %570 = vmatmul.f32.gmra.mxu2 %v464_v48 }
 0x1a2   :  { %716 = vst.msk [vmem:[%s1488_s9 + $0x8] sm:$0xff] %vm714_vm1, %v683_v49 }
 0x1a4   :  { %v409_v50 = vpop.f32.mrf.mxu1  ;;  %v523_v51 = vpop.f32.mrf.mxu2 }
 0x1a5   :  { %v827_v53 = vpop.eup %826  ;;  %v410_v54 = vadd.f32 %v1190_v52, %v409_v50  ;;  %v524_v55 = vadd.f32 %v1228_v26, %v523_v51 }
 0x1a6   :  { %v648_v56 = vmul.f32 %v827_v53, %v1235_v31 }
 0x1a7   :  { %v465_v57 = vmax.f32 %v410_v54, 0.0  ;;  %828 = vtanh.f32 %v524_v55 }
 0x1a8   :  { %v684_v58 = vadd.f32 %v1240_v32, %v648_v56 }
 0x1a9   :  { %573 = vmatmul.f32.gmra.mxu2 %v465_v57 }
 0x1aa   :  { %717 = vst.msk [vmem:[%s1488_s9 + $0x10] sm:$0xff] %vm714_vm1, %v684_v58 }
 0x1ac   :  { %v412_v59 = vpop.f32.mrf.mxu1  ;;  %v526_v60 = vpop.f32.mrf.mxu2 }
 0x1ad   :  { %v829_v61 = vpop.eup %828  ;;  %v413_v62 = vadd.f32 %v1190_v52, %v412_v59  ;;  %v527_v63 = vadd.f32 %v1228_v26, %v526_v60 }
 0x1ae   :  { %v649_v0 = vmul.f32 %v829_v61, %v1235_v31 }
 0x1af   :  { %v466_v1 = vmax.f32 %v413_v62, 0.0  ;;  %830 = vtanh.f32 %v527_v63 }
 0x1b0   :  { %v685_v2 = vadd.f32 %v1240_v32, %v649_v0 }
 0x1b1   :  { %576 = vmatmul.f32.gmra.mxu2 %v466_v1 }
 0x1b2   :  { %718 = vst.msk [vmem:[%s1488_s9 + $0x18] sm:$0xff] %vm714_vm1, %v685_v2 }
 0x1b4   :  { %v415_v3 = vpop.f32.mrf.mxu1  ;;  %v529_v4 = vpop.f32.mrf.mxu2 }
 0x1b5   :  { %v831_v5 = vpop.eup %830  ;;  %v416_v6 = vadd.f32 %v1190_v52, %v415_v3  ;;  %v530_v7 = vadd.f32 %v1228_v26, %v529_v4 }
 0x1b6   :  { %v650_v8 = vmul.f32 %v831_v5, %v1235_v31 }
 0x1b7   :  { %v467_v9 = vmax.f32 %v416_v6, 0.0  ;;  %832 = vtanh.f32 %v530_v7 }
 0x1b8   :  { %v686_v10 = vadd.f32 %v1240_v32, %v650_v8 }
 0x1b9   :  { %579 = vmatmul.f32.gmra.mxu2 %v467_v9 }
 0x1ba   :  { %719 = vst.msk [vmem:[%s1488_s9 + $0x20] sm:$0xff] %vm714_vm1, %v686_v10 }
 0x1bc   :  { %v418_v11 = vpop.f32.mrf.mxu1  ;;  %v532_v12 = vpop.f32.mrf.mxu2 }
 0x1bd   :  { %v833_v13 = vpop.eup %832  ;;  %v419_v14 = vadd.f32 %v1190_v52, %v418_v11  ;;  %v533_v15 = vadd.f32 %v1228_v26, %v532_v12 }
 0x1be   :  { %v651_v16 = vmul.f32 %v833_v13, %v1235_v31 }
 0x1bf   :  { %v468_v17 = vmax.f32 %v419_v14, 0.0  ;;  %834 = vtanh.f32 %v533_v15 }
 0x1c0   :  { %v687_v18 = vadd.f32 %v1240_v32, %v651_v16 }
 0x1c1   :  { %582 = vmatmul.f32.gmra.mxu2 %v468_v17 }
 0x1c2   :  { %720 = vst.msk [vmem:[%s1488_s9 + $0x28] sm:$0xff] %vm714_vm1, %v687_v18 }
 0x1c4   :  { %v535_v19 = vpop.f32.mrf.mxu2 }
 0x1c5   :  { %v835_v20 = vpop.eup %834  ;;  %v536_v21 = vadd.f32 %v1228_v26, %v535_v19 }
 0x1c6   :  { %v652_v22 = vmul.f32 %v835_v20, %v1235_v31 }
 0x1c7   :  { %836 = vtanh.f32 %v536_v21 }
 0x1c8   :  { %v688_v23 = vadd.f32 %v1240_v32, %v652_v22 }
 0x1ca   :  { %721 = vst.msk [vmem:[%s1488_s9 + $0x30] sm:$0xff] %vm714_vm1, %v688_v23  ;;  %v421_v24 = vpop.f32.mrf.mxu3 }
 0x1cb   :  { %v422_v25 = vadd.f32 %v1190_v52, %v421_v24 }
 0x1cc   :  { %v538_v27 = vpop.f32.mrf.mxu2 }
 0x1cd   :  { %v837_v34 = vpop.eup %836  ;;  %v469_v28 = vmax.f32 %v422_v25, 0.0  ;;  %v539_v29 = vadd.f32 %v1228_v26, %v538_v27 }
 0x1ce   :  { %v653_v30 = vmul.f32 %v837_v34, %v1235_v31 }
 0x1cf   :  { %838 = vtanh.f32 %v539_v29  ;;  %585 = vmatmul.f32.vlgmr.msra.gmra.mxu3 %v469_v28 }
 0x1d0   :  { %v689_v33 = vadd.f32 %v1240_v32, %v653_v30 }
 0x1d2   :  { %722 = vst.msk [vmem:[%s1488_s9 + $0x38] sm:$0xff] %vm714_vm1, %v689_v33  ;;  %v424_v35 = vpop.f32.mrf.mxu3 }
 0x1d3   :  { %v425_v36 = vadd.f32 %v1190_v52, %v424_v35 }
 0x1d4   :  { %v541_v37 = vpop.f32.mrf.mxu2 }
 0x1d5   :  { %v839_v38 = vpop.eup %838  ;;  %v470_v39 = vmax.f32 %v425_v36, 0.0  ;;  %v542_v40 = vadd.f32 %v1228_v26, %v541_v37 }
 0x1d6   :  { %v654_v41 = vmul.f32 %v839_v38, %v1235_v31 }
 0x1d7   :  { %840 = vtanh.f32 %v542_v40  ;;  %588 = vmatmul.f32.gmra.mxu3 %v470_v39 }
 0x1d8   :  { %v690_v42 = vadd.f32 %v1240_v32, %v654_v41 }
 0x1da   :  { %723 = vst.msk [vmem:[%s1488_s9 + $0x40] sm:$0xff] %vm714_vm1, %v690_v42  ;;  %v427_v43 = vpop.f32.mrf.mxu3 }
 0x1db   :  { %v428_v44 = vadd.f32 %v1190_v52, %v427_v43 }
 0x1dc   :  { %v544_v45 = vpop.f32.mrf.mxu2 }
 0x1dd   :  { %v841_v46 = vpop.eup %840  ;;  %v471_v47 = vmax.f32 %v428_v44, 0.0  ;;  %v545_v48 = vadd.f32 %v1228_v26, %v544_v45 }
 0x1de   :  { %v655_v49 = vmul.f32 %v841_v46, %v1235_v31 }
 0x1df   :  { %842 = vtanh.f32 %v545_v48  ;;  %591 = vmatmul.f32.gmra.mxu3 %v471_v47 }
 0x1e0   :  { %v691_v50 = vadd.f32 %v1240_v32, %v655_v49 }
 0x1e2   :  { %724 = vst.msk [vmem:[%s1488_s9 + $0x48] sm:$0xff] %vm714_vm1, %v691_v50  ;;  %v430_v51 = vpop.f32.mrf.mxu3 }
 0x1e3   :  { %v431_v53 = vadd.f32 %v1190_v52, %v430_v51 }
 0x1e4   :  { %v547_v54 = vpop.f32.mrf.mxu2 }
 0x1e5   :  { %v843_v55 = vpop.eup %842  ;;  %v472_v56 = vmax.f32 %v431_v53, 0.0  ;;  %v548_v57 = vadd.f32 %v1228_v26, %v547_v54 }
 0x1e6   :  { %v656_v58 = vmul.f32 %v843_v55, %v1235_v31 }
 0x1e7   :  { %844 = vtanh.f32 %v548_v57  ;;  %594 = vmatmul.f32.gmra.mxu3 %v472_v56 }
 0x1e8   :  { %v692_v59 = vadd.f32 %v1240_v32, %v656_v58 }
 0x1ea   :  { %725 = vst.msk [vmem:[%s1488_s9 + $0x50] sm:$0xff] %vm714_vm1, %v692_v59  ;;  %v433_v60 = vpop.f32.mrf.mxu3 }
 0x1eb   :  { %v434_v61 = vadd.f32 %v1190_v52, %v433_v60 }
 0x1ec   :  { %v550_v62 = vpop.f32.mrf.mxu2 }
 0x1ed   :  { %v845_v63 = vpop.eup %844  ;;  %v473_v0 = vmax.f32 %v434_v61, 0.0  ;;  %v551_v1 = vadd.f32 %v1228_v26, %v550_v62 }
 0x1ee   :  { %v657_v2 = vmul.f32 %v845_v63, %v1235_v31 }
 0x1ef   :  { %846 = vtanh.f32 %v551_v1  ;;  %597 = vmatmul.f32.gmra.mxu3 %v473_v0 }
 0x1f0   :  { %v693_v3 = vadd.f32 %v1240_v32, %v657_v2 }
 0x1f2   :  { %726 = vst.msk [vmem:[%s1488_s9 + $0x58] sm:$0xff] %vm714_vm1, %v693_v3  ;;  %v436_v4 = vpop.f32.mrf.mxu3 }
 0x1f3   :  { %v437_v5 = vadd.f32 %v1190_v52, %v436_v4 }
 0x1f4   :  { %v553_v6 = vpop.f32.mrf.mxu2 }
 0x1f5   :  { %v847_v7 = vpop.eup %846  ;;  %v474_v8 = vmax.f32 %v437_v5, 0.0  ;;  %v554_v9 = vadd.f32 %v1228_v26, %v553_v6 }
 0x1f6   :  { %v658_v10 = vmul.f32 %v847_v7, %v1235_v31 }
 0x1f7   :  { %848 = vtanh.f32 %v554_v9  ;;  %600 = vmatmul.f32.gmra.mxu3 %v474_v8 }
 0x1f8   :  { %v694_v11 = vadd.f32 %v1240_v32, %v658_v10 }
 0x1fa   :  { %727 = vst.msk [vmem:[%s1488_s9 + $0x60] sm:$0xff] %vm714_vm1, %v694_v11  ;;  %v439_v12 = vpop.f32.mrf.mxu3 }
 0x1fb   :  { %v440_v13 = vadd.f32 %v1190_v52, %v439_v12 }
 0x1fc   :  { %v556_v14 = vpop.f32.mrf.mxu2 }
 0x1fd   :  { %v849_v15 = vpop.eup %848  ;;  %v475_v16 = vmax.f32 %v440_v13, 0.0  ;;  %v557_v17 = vadd.f32 %v1228_v26, %v556_v14 }
 0x1fe   :  { %v659_v18 = vmul.f32 %v849_v15, %v1235_v31 }
 0x1ff   :  { %850 = vtanh.f32 %v557_v17  ;;  %603 = vmatmul.f32.gmra.mxu3 %v475_v16 }
 0x200   :  { %v695_v19 = vadd.f32 %v1240_v32, %v659_v18 }
 0x202   :  { %728 = vst.msk [vmem:[%s1488_s9 + $0x68] sm:$0xff] %vm714_vm1, %v695_v19  ;;  %v442_v20 = vpop.f32.mrf.mxu3 }
 0x203   :  { %v443_v21 = vadd.f32 %v1190_v52, %v442_v20 }
 0x204   :  { %v559_v22 = vpop.f32.mrf.mxu2 }
 0x205   :  { %v851_v23 = vpop.eup %850  ;;  %v476_v24 = vmax.f32 %v443_v21, 0.0  ;;  %v560_v25 = vadd.f32 %v1228_v26, %v559_v22 }
 0x206   :  { %v660_v27 = vmul.f32 %v851_v23, %v1235_v31 }
 0x207   :  { %852 = vtanh.f32 %v560_v25  ;;  %606 = vmatmul.f32.gmra.mxu3 %v476_v24 }
 0x208   :  { %v696_v34 = vadd.f32 %v1240_v32, %v660_v27 }
 0x20a   :  { %729 = vst.msk [vmem:[%s1488_s9 + $0x70] sm:$0xff] %vm714_vm1, %v696_v34 }
 0x20c   :  { %v562_v28 = vpop.f32.mrf.mxu2 }
 0x20d   :  { %v853_v29 = vpop.eup %852  ;;  %v563_v52 = vadd.f32 %v1228_v26, %v562_v28 }
 0x20e   :  { %v661_v30 = vmul.f32 %v853_v29, %v1235_v31 }
 0x20f   :  { %854 = vtanh.f32 %v563_v52 }
 0x210   :  { %v697_v33 = vadd.f32 %v1240_v32, %v661_v30 }
 0x212   :  { %730 = vst.msk [vmem:[%s1488_s9 + $0x78] sm:$0xff] %vm714_vm1, %v697_v33 }
 0x214   :  { %v565_v35 = vpop.f32.mrf.mxu2 }
 0x215   :  { %v855_v36 = vpop.eup %854  ;;  %v566_v37 = vadd.f32 %v1228_v26, %v565_v35 }
 0x216   :  { %v662_v38 = vmul.f32 %v855_v36, %v1235_v31 }
 0x217   :  { %856 = vtanh.f32 %v566_v37 }
 0x218   :  { %v698_v39 = vadd.f32 %v1240_v32, %v662_v38 }
 0x21a   :  { %731 = vst.msk [vmem:[%s1488_s9 + $0x80] sm:$0xff] %vm714_vm1, %v698_v39 }
 0x21c   :  { %v568_v40 = vpop.f32.mrf.mxu2 }
 0x21d   :  { %v857_v41 = vpop.eup %856  ;;  %v569_v42 = vadd.f32 %v1228_v26, %v568_v40 }
 0x21e   :  { %v663_v43 = vmul.f32 %v857_v41, %v1235_v31 }
 0x21f   :  { %858 = vtanh.f32 %v569_v42 }
 0x220   :  { %v699_v44 = vadd.f32 %v1240_v32, %v663_v43 }
 0x222   :  { %732 = vst.msk [vmem:[%s1488_s9 + $0x88] sm:$0xff] %vm714_vm1, %v699_v44 }
 0x224   :  { %v571_v45 = vpop.f32.mrf.mxu2 }
 0x225   :  { %v859_v46 = vpop.eup %858  ;;  %v572_v47 = vadd.f32 %v1228_v26, %v571_v45 }
 0x226   :  { %v664_v48 = vmul.f32 %v859_v46, %v1235_v31 }
 0x227   :  { %860 = vtanh.f32 %v572_v47 }
 0x228   :  { %v700_v49 = vadd.f32 %v1240_v32, %v664_v48 }
 0x22a   :  { %733 = vst.msk [vmem:[%s1488_s9 + $0x90] sm:$0xff] %vm714_vm1, %v700_v49 }
 0x22c   :  { %v574_v50 = vpop.f32.mrf.mxu2 }
 0x22d   :  { %v861_v51 = vpop.eup %860  ;;  %v575_v53 = vadd.f32 %v1228_v26, %v574_v50 }
 0x22e   :  { %v665_v54 = vmul.f32 %v861_v51, %v1235_v31 }
 0x22f   :  { %862 = vtanh.f32 %v575_v53 }
 0x230   :  { %v701_v55 = vadd.f32 %v1240_v32, %v665_v54 }
 0x232   :  { %734 = vst.msk [vmem:[%s1488_s9 + $0x98] sm:$0xff] %vm714_vm1, %v701_v55 }
 0x234   :  { %v577_v56 = vpop.f32.mrf.mxu2 }
 0x235   :  { %v863_v57 = vpop.eup %862  ;;  %v578_v58 = vadd.f32 %v1228_v26, %v577_v56 }
 0x236   :  { %v666_v59 = vmul.f32 %v863_v57, %v1235_v31 }
 0x237   :  { %864 = vtanh.f32 %v578_v58 }
 0x238   :  { %v702_v60 = vadd.f32 %v1240_v32, %v666_v59 }
 0x23a   :  { %735 = vst.msk [vmem:[%s1488_s9 + $0xa0] sm:$0xff] %vm714_vm1, %v702_v60 }
 0x23c   :  { %v580_v61 = vpop.f32.mrf.mxu2 }
 0x23d   :  { %v865_v62 = vpop.eup %864  ;;  %v581_v63 = vadd.f32 %v1228_v26, %v580_v61 }
 0x23e   :  { %v667_v0 = vmul.f32 %v865_v62, %v1235_v31 }
 0x23f   :  { %866 = vtanh.f32 %v581_v63 }
 0x240   :  { %v703_v1 = vadd.f32 %v1240_v32, %v667_v0 }
 0x242   :  { %736 = vst.msk [vmem:[%s1488_s9 + $0xa8] sm:$0xff] %vm714_vm1, %v703_v1 }
 0x244   :  { %v583_v2 = vpop.f32.mrf.mxu2 }
 0x245   :  { %v867_v3 = vpop.eup %866  ;;  %v584_v4 = vadd.f32 %v1228_v26, %v583_v2 }
 0x246   :  { %v668_v5 = vmul.f32 %v867_v3, %v1235_v31 }
 0x247   :  { %868 = vtanh.f32 %v584_v4 }
 0x248   :  { %v704_v6 = vadd.f32 %v1240_v32, %v668_v5 }
 0x24a   :  { %737 = vst.msk [vmem:[%s1488_s9 + $0xb0] sm:$0xff] %vm714_vm1, %v704_v6 }
 0x24d   :  { %v869_v7 = vpop.eup %868 }
 0x24e   :  { %v669_v8 = vmul.f32 %v869_v7, %v1235_v31 }
 0x250   :  { %v705_v9 = vadd.f32 %v1240_v32, %v669_v8 }
 0x252   :  { %738 = vst.msk [vmem:[%s1488_s9 + $0xb8] sm:$0xff] %vm714_vm1, %v705_v9  ;;  %v586_v10 = vpop.f32.mrf.mxu3 }
 0x253   :  { %v587_v11 = vadd.f32 %v1228_v26, %v586_v10 }
 0x255   :  { %870 = vtanh.f32 %v587_v11 }
 0x25a   :  { %v589_v12 = vpop.f32.mrf.mxu3 }
 0x25b   :  { %v871_v13 = vpop.eup %870  ;;  %v590_v14 = vadd.f32 %v1228_v26, %v589_v12 }
 0x25c   :  { %v670_v15 = vmul.f32 %v871_v13, %v1235_v31 }
 0x25d   :  { %872 = vtanh.f32 %v590_v14 }
 0x25e   :  { %v706_v16 = vadd.f32 %v1240_v32, %v670_v15 }
 0x260   :  { %739 = vst.msk [vmem:[%s1488_s9 + $0xc0] sm:$0xff] %vm714_vm1, %v706_v16 }
 0x262   :  { %v592_v17 = vpop.f32.mrf.mxu3 }
 0x263   :  { %v873_v18 = vpop.eup %872  ;;  %v593_v19 = vadd.f32 %v1228_v26, %v592_v17 }
 0x264   :  { %v671_v20 = vmul.f32 %v873_v18, %v1235_v31 }
 0x265   :  { %874 = vtanh.f32 %v593_v19 }
 0x266   :  { %v707_v21 = vadd.f32 %v1240_v32, %v671_v20 }
 0x268   :  { %740 = vst.msk [vmem:[%s1488_s9 + $0xc8] sm:$0xff] %vm714_vm1, %v707_v21 }
 0x26a   :  { %v595_v22 = vpop.f32.mrf.mxu3 }
 0x26b   :  { %v875_v23 = vpop.eup %874  ;;  %v596_v24 = vadd.f32 %v1228_v26, %v595_v22 }
 0x26c   :  { %v672_v25 = vmul.f32 %v875_v23, %v1235_v31 }
 0x26d   :  { %876 = vtanh.f32 %v596_v24 }
 0x26e   :  { %v708_v27 = vadd.f32 %v1240_v32, %v672_v25 }
 0x270   :  { %741 = vst.msk [vmem:[%s1488_s9 + $0xd0] sm:$0xff] %vm714_vm1, %v708_v27 }
 0x272   :  { %v598_v34 = vpop.f32.mrf.mxu3 }
 0x273   :  { %v877_v28 = vpop.eup %876  ;;  %v599_v29 = vadd.f32 %v1228_v26, %v598_v34 }
 0x274   :  { %v673_v52 = vmul.f32 %v877_v28, %v1235_v31 }
 0x275   :  { %878 = vtanh.f32 %v599_v29 }
 0x276   :  { %v709_v30 = vadd.f32 %v1240_v32, %v673_v52 }
 0x278   :  { %742 = vst.msk [vmem:[%s1488_s9 + $0xd8] sm:$0xff] %vm714_vm1, %v709_v30 }
 0x27a   :  { %v601_v33 = vpop.f32.mrf.mxu3 }
 0x27b   :  { %v879_v35 = vpop.eup %878  ;;  %v602_v36 = vadd.f32 %v1228_v26, %v601_v33 }
 0x27c   :  { %v674_v37 = vmul.f32 %v879_v35, %v1235_v31 }
 0x27d   :  { %880 = vtanh.f32 %v602_v36 }
 0x27e   :  { %v710_v38 = vadd.f32 %v1240_v32, %v674_v37 }
 0x280   :  { %743 = vst.msk [vmem:[%s1488_s9 + $0xe0] sm:$0xff] %vm714_vm1, %v710_v38 }
 0x282   :  { %v604_v39 = vpop.f32.mrf.mxu3 }
 0x283   :  { %v881_v40 = vpop.eup %880  ;;  %v605_v41 = vadd.f32 %v1228_v26, %v604_v39 }
 0x284   :  { %v675_v42 = vmul.f32 %v881_v40, %v1235_v31 }
 0x285   :  { %882 = vtanh.f32 %v605_v41 }
 0x286   :  { %v711_v43 = vadd.f32 %v1240_v32, %v675_v42 }
 0x288   :  { %744 = vst.msk [vmem:[%s1488_s9 + $0xe8] sm:$0xff] %vm714_vm1, %v711_v43 }
 0x28a   :  { %v607_v44 = vpop.f32.mrf.mxu3 }
 0x28b   :  { %v883_v45 = vpop.eup %882  ;;  %v608_v46 = vadd.f32 %v1228_v26, %v607_v44 }
 0x28c   :  { %v676_v47 = vmul.f32 %v883_v45, %v1235_v31 }
 0x28d   :  { %884 = vtanh.f32 %v608_v46 }
 0x28e   :  { %v712_v48 = vadd.f32 %v1240_v32, %v676_v47 }
 0x290   :  { %745 = vst.msk [vmem:[%s1488_s9 + $0xf0] sm:$0xff] %vm714_vm1, %v712_v48 }
 0x293   :  { %v885_v49 = vpop.eup %884 }
 0x294   :  { %v677_v50 = vmul.f32 %v885_v49, %v1235_v31 }
 0x296   :  { %v713_v51 = vadd.f32 %v1240_v32, %v677_v50 }
 0x298   :  { %746 = vst.msk [vmem:[%s1488_s9 + $0xf8] sm:$0xff] %vm714_vm1, %v713_v51 }

</bundles_post_ra>
